<compile_context>
chip_gen: v5e
topology: v5e:2x2
jax: 0.10.0
libtpu: 0.0.40
codegen_flags: <defaults>
</compile_context>

<pallas_src>
import jax
import jax.numpy as jnp
from jax.experimental import pallas as pl
from jax.experimental.pallas import tpu as pltpu


def _pick_tile(dim, target, align):
    """Largest multiple of `align` that divides `dim` and is <= target.

    Falls back to the full dimension when `dim` is not a multiple of `align`
    (full-extent blocks are always legal)."""
    if dim % align != 0:
        return dim
    best = align
    t = align
    limit = min(dim, max(target, align))
    while t <= limit:
        if dim % t == 0:
            best = t
        t += align
    return best


def _vmem_budget():
    """(per-stream block byte target, vmem_limit_bytes) — generation aware."""
    try:
        cap = int(pltpu.get_tpu_info().vmem_capacity_bytes)
    except Exception:
        cap = 0
    if cap >= 100 * 1024 * 1024:          # v5e / v6e: 128 MiB physical VMEM
        return 8 << 20, 64 << 20
    return 4 << 20, 32 << 20              # v7x (64 MiB physical) or unknown


def _make_kernel(has_bias, n_c_tiles, t_c):
    """Elementwise kernel: out = x + z * a (+ bias), computed in f32."""
    def kernel(x_ref, z_ref, a_ref, *rest):
        # x_ref: (1, t_c, t_hw)   z_ref: (1, 1, t_hw)   a_ref/b_ref: (C, 1) f32
        if has_bias:
            b_ref, o_ref = rest
        else:
            (o_ref,) = rest
            b_ref = None

        if n_c_tiles > 1:
            # a / bias are resident full-extent; slice the current channel tile.
            off = pl.multiple_of(pl.program_id(2) * t_c, t_c)
            a_v = a_ref[pl.ds(off, t_c), :]
            b_v = b_ref[pl.ds(off, t_c), :] if has_bias else None
        else:
            a_v = a_ref[...]
            b_v = b_ref[...] if has_bias else None

        out = x_ref[...].astype(jnp.float32) + z_ref[...].astype(jnp.float32) * a_v
        if has_bias:
            out = out + b_v
        o_ref[...] = out.astype(o_ref.dtype)
    return kernel


def noise_forward(x, a, bias=None, z=None, seed=0, inplace=False,
                  min_pallas_bytes=2 * 1024 * 1024):
    """Pallas equivalent of Noise.forward.

    x    : (N, C, H, W)
    a    : (C, 1, 1) learnable per-channel std
    bias : (C, 1, 1) or None
    z    : optional (N, 1, H, W) noise; generated from `seed` if None
    inplace : donate x's buffer to the output (functional analogue of x.add_)
    min_pallas_bytes : below this total size, use plain jnp (XLA fusion wins)
    """
    N, C, H, W = x.shape
    HW = H * W
    dt = x.dtype
    itemsize = jnp.dtype(dt).itemsize
    has_bias = bias is not None

    if z is None:
        z = jax.random.normal(jax.random.PRNGKey(seed), (N, 1, H, W), dtype=dt)
    else:
        assert z.shape == (N, 1, H, W), f"z must be (N,1,H,W), got {z.shape}"

    # ---------------- small-tensor fallback (launch overhead dominates) -----
    if N * C * HW * itemsize < min_pallas_bytes:
        a4 = a.reshape(1, C, 1, 1).astype(jnp.float32)
        out = x.astype(jnp.float32) + z.astype(jnp.float32) * a4
        if has_bias:
            out = out + bias.reshape(1, C, 1, 1).astype(jnp.float32)
        return out.astype(dt)

    # ---------------- layout: lane-dense HW last dim, padded to 128 ---------
    block_bytes, vmem_limit = _vmem_budget()
    sub_align = max(8, 32 // itemsize)         # 8 f32 / 16 bf16 / 32 int8-fp8

    HW_pad = ((HW + 127) // 128) * 128
    x3 = x.reshape(N, C, HW)
    z3 = z.reshape(N, 1, HW).astype(dt)
    padded = HW_pad != HW
    if padded:
        pad = HW_pad - HW
        x3 = jnp.pad(x3, ((0, 0), (0, 0), (0, pad)))
        z3 = jnp.pad(z3, ((0, 0), (0, 0), (0, pad)))

    a2 = a.reshape(C, 1).astype(jnp.float32)
    b2 = bias.reshape(C, 1).astype(jnp.float32) if has_bias else None

    # ---------------- tile selection: grow the lane dim first ---------------
    hw_target = max(128, block_bytes // (itemsize * sub_align))
    t_hw = _pick_tile(HW_pad, min(HW_pad, hw_target), 128)
    c_target = max(sub_align, block_bytes // (t_hw * itemsize))
    t_c = _pick_tile(C, c_target, sub_align)
    if t_c * t_hw * itemsize > block_bytes:
        # non-aligned C forced a full-extent channel block; shrink t_hw to fit
        t_hw = _pick_tile(HW_pad, max(128, block_bytes // (t_c * itemsize)), 128)

    n_hw = HW_pad // t_hw
    n_c = C // t_c
    grid = (N, n_hw, n_c)          # C innermost -> z tile stays resident

    x_spec = pl.BlockSpec((1, t_c, t_hw), lambda n, hw, c: (n, c, hw))
    o_spec = pl.BlockSpec((1, t_c, t_hw), lambda n, hw, c: (n, c, hw))
    z_spec = pl.BlockSpec((1, 1, t_hw), lambda n, hw, c: (n, 0, hw))
    # a / bias: constant block index -> DMA'd once, resident for the whole grid.
    p_spec = pl.BlockSpec((C, 1), lambda n, hw, c: (0, 0))

    in_specs = [x_spec, z_spec, p_spec] + ([p_spec] if has_bias else [])
    args = (x3, z3, a2) + ((b2,) if has_bias else ())

    io_aliases = {0: 0} if (inplace and not padded) else {}

    out = pl.pallas_call(
        _make_kernel(has_bias, n_c, t_c),
        out_shape=jax.ShapeDtypeStruct((N, C, HW_pad), dt),
        grid_spec=pltpu.PrefetchScalarGridSpec(
            num_scalar_prefetch=0, grid=grid,
            in_specs=in_specs, out_specs=o_spec),
        compiler_params=pltpu.CompilerParams(
            dimension_semantics=("parallel", "parallel", "arbitrary"),
            vmem_limit_bytes=vmem_limit),
        input_output_aliases=io_aliases,
    )(*args)

    if padded:
        out = out[:, :, :HW]
    return out.reshape(N, C, H, W)


if __name__ == "__main__":
    key = jax.random.PRNGKey(0)
    k_x, k_z, k_a, k_b, k_x2, k_z2 = jax.random.split(key, 6)

    N, C, H, W = 2, 4, 16, 16
    x = jax.random.normal(k_x, (N, C, H, W), dtype=jnp.float32)
    # Module __init__ uses zeros((C,1,1)); use non-zero values so the compute
    # path is actually exercised.
    a = 0.1 * jax.random.normal(k_a, (C, 1, 1), dtype=jnp.float32)
    bias = 0.05 * jax.random.normal(k_b, (C, 1, 1), dtype=jnp.float32)
    z = jax.random.normal(k_z, (N, 1, H, W), dtype=jnp.float32)

    # --- explicit z, with bias (min_pallas_bytes=0 forces the Pallas path)
    out = jax.block_until_ready(noise_forward(x, a, bias=bias, z=z, min_pallas_bytes=0))
    ref = x + z * a.reshape(1, C, 1, 1) + bias.reshape(1, C, 1, 1)
    assert out.shape == (N, C, H, W)
    assert jnp.allclose(out, ref, atol=1e-6, rtol=1e-6)

    # --- explicit z, no bias (specialized kernel)
    out_nb = jax.block_until_ready(noise_forward(x, a, bias=None, z=z, min_pallas_bytes=0))
    ref_nb = x + z * a.reshape(1, C, 1, 1)
    assert jnp.allclose(out_nb, ref_nb, atol=1e-6, rtol=1e-6)

    # --- z=None: wrapper-generated gaussian noise, reproducible from the seed
    seed = 123
    out_rng = jax.block_until_ready(
        noise_forward(x, a, bias=bias, seed=seed, min_pallas_bytes=0))
    z_rep = jax.random.normal(jax.random.PRNGKey(seed), (N, 1, H, W), dtype=x.dtype)
    ref_rng = x + z_rep * a.reshape(1, C, 1, 1) + bias.reshape(1, C, 1, 1)
    assert jnp.allclose(out_rng, ref_rng, atol=1e-6, rtol=1e-6)

    # --- HW not a multiple of 128 exercises the pad/slice path
    N2, C2, H2, W2 = 1, 8, 10, 12          # HW = 120 -> padded to 128
    x2 = jax.random.normal(k_x2, (N2, C2, H2, W2), dtype=jnp.float32)
    z2 = jax.random.normal(k_z2, (N2, 1, H2, W2), dtype=jnp.float32)
    a_2 = 0.2 * jnp.arange(1, C2 + 1, dtype=jnp.float32).reshape(C2, 1, 1)
    out2 = jax.block_until_ready(
        noise_forward(x2, a_2, bias=None, z=z2, min_pallas_bytes=0))
    ref2 = x2 + z2 * a_2.reshape(1, C2, 1, 1)
    assert jnp.allclose(out2, ref2, atol=1e-6, rtol=1e-6)

    # --- bf16 path (dtype-aware sublane alignment + f32 internal arithmetic)
    xb = x.astype(jnp.bfloat16)
    zb = z.astype(jnp.bfloat16)
    outb = jax.block_until_ready(
        noise_forward(xb, a, bias=bias, z=zb, min_pallas_bytes=0))
    refb = (xb.astype(jnp.float32) + zb.astype(jnp.float32) * a.reshape(1, C, 1, 1)
            + bias.reshape(1, C, 1, 1)).astype(jnp.bfloat16)
    assert jnp.allclose(outb.astype(jnp.float32), refb.astype(jnp.float32),
                        atol=1e-2, rtol=1e-2)

    # NOTE: noise_forward(..., inplace=True) donates x's buffer to the output
    # via input_output_aliases for torch's inplace=True use-case.

    print("KERNEL_OK")
</pallas_src>

<mosaic_0001>
module attributes {stable_mosaic.version = 11 : i64} {
  func.func @kernel(%arg0: i32, %arg1: i32, %arg2: i32, %arg3: memref<1x4x256xf32, #tpu.memory_space<vmem>>, %arg4: memref<1x1x256xf32, #tpu.memory_space<vmem>>, %arg5: memref<4x1xf32, #tpu.memory_space<vmem>>, %arg6: memref<4x1xf32, #tpu.memory_space<vmem>>, %arg7: memref<1x4x256xf32, #tpu.memory_space<vmem>>) attributes {dimension_semantics = [#tpu.dimension_semantics<parallel>, #tpu.dimension_semantics<parallel>, #tpu.dimension_semantics<arbitrary>], iteration_bounds = array<i64: 2, 1, 1>, scalar_prefetch = 0 : i64, scratch_operands = 0 : i64, tpu.core_type = #tpu.core_type<tc>, window_params = [{transform_indices = @transform_0, window_bounds = array<i64: 1, 4, 256>}, {transform_indices = @transform_1, window_bounds = array<i64: 1, 1, 256>}, {pipeline_mode = #tpu.pipeline_mode<synchronous>, transform_indices = @transform_2, window_bounds = array<i64: 4, 1>}, {pipeline_mode = #tpu.pipeline_mode<synchronous>, transform_indices = @transform_3, window_bounds = array<i64: 4, 1>}, {transform_indices = @transform_4, window_bounds = array<i64: 1, 4, 256>}]} {
    %c0 = arith.constant 0 : index
    %c0_0 = arith.constant 0 : index
    %0 = vector.load %arg5[%c0, %c0_0] : memref<4x1xf32, #tpu.memory_space<vmem>>, vector<4x1xf32>
    %c0_1 = arith.constant 0 : index
    %c0_2 = arith.constant 0 : index
    %1 = vector.load %arg6[%c0_1, %c0_2] : memref<4x1xf32, #tpu.memory_space<vmem>>, vector<4x1xf32>
    %c0_3 = arith.constant 0 : index
    %c0_4 = arith.constant 0 : index
    %c0_5 = arith.constant 0 : index
    %2 = vector.load %arg3[%c0_3, %c0_4, %c0_5] : memref<1x4x256xf32, #tpu.memory_space<vmem>>, vector<1x4x256xf32>
    %c0_6 = arith.constant 0 : index
    %c0_7 = arith.constant 0 : index
    %c0_8 = arith.constant 0 : index
    %3 = vector.load %arg4[%c0_6, %c0_7, %c0_8] : memref<1x1x256xf32, #tpu.memory_space<vmem>>, vector<1x1x256xf32>
    %4 = vector.shape_cast %0 : vector<4x1xf32> to vector<1x4x1xf32>
    %5 = vector.broadcast %3 : vector<1x1x256xf32> to vector<1x4x256xf32>
    %6 = vector.broadcast %4 : vector<1x4x1xf32> to vector<1x4x256xf32>
    %7 = arith.mulf %5, %6 : vector<1x4x256xf32>
    %8 = arith.addf %2, %7 : vector<1x4x256xf32>
    %9 = vector.shape_cast %1 : vector<4x1xf32> to vector<1x4x1xf32>
    %10 = vector.broadcast %9 : vector<1x4x1xf32> to vector<1x4x256xf32>
    %11 = arith.addf %8, %10 : vector<1x4x256xf32>
    %c0_9 = arith.constant 0 : index
    %c0_10 = arith.constant 0 : index
    %c0_11 = arith.constant 0 : index
    %12 = vector.load %arg7[%c0_9, %c0_10, %c0_11] : memref<1x4x256xf32, #tpu.memory_space<vmem>>, vector<1x4x256xf32>
    tpu.vector_store %arg7[%c0_9, %c0_10, %c0_11], %11 {strides = array<i32>} : memref<1x4x256xf32, #tpu.memory_space<vmem>>, vector<1x4x256xf32>,
    return
  }
  func.func @transform_0(%arg0: i32, %arg1: i32, %arg2: i32) -> (i32, i32, i32) {
    %c0_i32 = arith.constant 0 : i32
    return %arg0, %arg2, %arg1 : i32, i32, i32
  }
  func.func @transform_1(%arg0: i32, %arg1: i32, %arg2: i32) -> (i32, i32, i32) {
    %c0_i32 = arith.constant 0 : i32
    %c0_i32_0 = arith.constant 0 : i32
    return %arg0, %c0_i32, %arg1 : i32, i32, i32
  }
  func.func @transform_2(%arg0: i32, %arg1: i32, %arg2: i32) -> (i32, i32) {
    %c0_i32 = arith.constant 0 : i32
    %c0_i32_0 = arith.constant 0 : i32
    %c0_i32_1 = arith.constant 0 : i32
    return %c0_i32, %c0_i32_0 : i32, i32
  }
  func.func @transform_3(%arg0: i32, %arg1: i32, %arg2: i32) -> (i32, i32) {
    %c0_i32 = arith.constant 0 : i32
    %c0_i32_0 = arith.constant 0 : i32
    %c0_i32_1 = arith.constant 0 : i32
    return %c0_i32, %c0_i32_0 : i32, i32
  }
  func.func @transform_4(%arg0: i32, %arg1: i32, %arg2: i32) -> (i32, i32, i32) {
    %c0_i32 = arith.constant 0 : i32
    return %arg0, %arg2, %arg1 : i32, i32, i32
  }
}

</mosaic_0001>

<bundles_post_ra>
// kernel: tpu_custom_call.1
= control target key start
LH: loop header
LB: loop body
LE: loop exit
PB: predicated region body
PF: predicated region fallthrough
CT: control target
= control target key end

     0   :  { %9 = vsyncpa [#allocation3], 0  ;;  %s798_s0 = inlined_call_operand.hbm [shape: f32[2,4,256], index: 0, kind: input, shape index: {}]   ;;  %s799_s1 = inlined_call_operand.vmem [shape: f32[2,1,256], index: 1, kind: input, shape index: {}]   ;;  %s800_s2 = inlined_call_operand.vmem [shape: f32[4,1], index: 2, kind: input, shape index: {}]   ;;  %s801_s3 = inlined_call_operand.vmem [shape: f32[4,1], index: 3, kind: input, shape index: {}]   ;;  %s802_s4 = inlined_call_operand.hbm [shape: f32[2,4,256], index: 4, kind: output, shape index: {}]  }
   0x1   :  { %11 = vsyncpa [#allocation3 + $0x1], 0 }
   0x2   :  { %12 = vsyncpa [#allocation4], 0 }
   0x3   :  { %14 = vsyncpa [#allocation4 + $0x1], 0  ;;  %s667_s15 = smov 0   ;;  %s669_s16 = smov 0  }
   0x4   :  { %s671_s17 = smov 0   ;;  %s673_s18 = smov 0  }
   0x5   :  { %s675_s19 = smov 0   ;;  %s677_s20 = smov 0  }
   0x6 LB: > { %s443_s21 = sadd.s32 4294967295, %s638_s20   ;;  %s444_s22 = sadd.s32 4294967294, %s638_s20   ;;  %s638_s20 = sphi %s677_s20, %s20_s20   ;;  %s634_s19 = sphi %s675_s19, %s811_s19   ;;  %s630_s18 = sphi %s673_s18, %s810_s18   ;;  %s626_s17 = sphi %s671_s17, %s809_s17   ;;  %s622_s16 = sphi %s669_s16, %s808_s16   ;;  %s618_s15 = sphi %s667_s15, %s807_s15  }
   0x7   : > { %s39_s23 = sadd.s32 1, %s634_s19  ;;  %s50_s24 = sadd.s32 1, %s626_s17 }
   0x8   : > { %p41_p0 = scmp.ge.s32.totalorder %s39_s23, 2  ;;  %p57_p1 = scmp.ne.s32.totalorder %s626_s17, %s622_s16 }
   0x9   : > { %p58_p2 = scmp.eq.s32.totalorder %s638_s20, 0  ;;  %p63_p3 = scmp.ne.s32.totalorder %s622_s16, %s618_s15 }
   0xa   : > { %s813_s23 = smov (%p41_p0, %s39_s23), 0  ;;  %p64_p5 = scmp.eq.s32.totalorder %s443_s21, 0 }
   0xb   : > { %p708_p4 = por %p58_p2, %p57_p1  ;;  %s43_s26 = ssub.s32 %s634_s19, %s813_s23 }
   0xc   : > { %p161_p6 = scmp.eq.s32.totalorder %s443_s21, 1  ;;  %p48_p7 = scmp.eq.s32.totalorder %s43_s26, 0 }
   0xd   : > { %p714_p8 = por %p64_p5, %p63_p3  ;;  %p167_p10 = scmp.eq.s32.totalorder %s444_s22, 1 }
   0xe   : > { %p718_p9 = por %p161_p6, %p57_p1  ;;  %p446_p12 = scmp.ge.s32.totalorder %s638_s20, 2 }
   0xf   : > { %s723_s29 = scalar_select %p48_p7, %s626_s17, %s50_s24  }
  0x10   : > { %p725_p11 = por %p167_p10, %p63_p3  ;;  %p473_p13 = scmp.lt.s32.totalorder %s638_s20, 2 }
  0x11   : > { %s193_s5 = sand.u32 1, %s626_s17   ;;  %s459_s7 = sshll.u32 %s634_s19, 3 }
  0x12   : > { %s447_s6 = sshll.u32 %s193_s5, 3  ;;  %s206_s10 = scalar_lea.hbm %s798_s0, %s459_s7 }
  0x13   : > { %s197_s11 = scalar_lea.vmem [#allocation2], %s447_s6  ;;  %s208_s13 = sshll.u32 %s206_s10, 4  ;;  %s209_s13 = int_to_ptr.hbm [resolvable:$true] %s208_s13 }
  0x14   : > { %s210_s12 = sshll.u32 %s197_s11, 4  ;;  %p466_p0 = pnand %p473_p13, %p708_p4  ;;  %s211_s12 = int_to_ptr.vmem [resolvable:$true] %s210_s12 }
  0x15   : > { %p450_p1 = scmp.ge.s32.totalorder %s638_s20, 1  ;;  %p227_p2 = scmp.lt.s32.totalorder %s638_s20, 3 }
  0x16   : > { %s194_s14 = scalar_lea.sflag [#allocation3], %s193_s5 }
  0x17   : > { %468 = dma.hbm_to_vmem [thread:$0]  (!%p466_p0), %s209_s13, 128, %s211_s12, %s194_s14  }
  0x18   : > { %p228_p3 = pnand %p450_p1, %p227_p2 }
  0x19   : > { %s741_s21 = sand.u32 (!%p228_p3), 1, %s622_s16  }
  0x1a   : > { %231 = sbr.rel (%p228_p3) target bundleno = 164 (0xa4), region = 36  ;;  %s451_s22 = sshll.u32 (!%p228_p3), %s741_s21, 3 }
  0x1b   : > { %s234_s24 = scalar_lea.sflag (!%p228_p3), [#allocation3], %s741_s21  ;;  %s237_s26 = scalar_lea.vmem (!%p228_p3), [#allocation2], %s451_s22 }
  0x1f   : > { %609 = dma.done.wait (%p714_p8), %s234_s24, 128  }
  0x20   : > { %611 = vsyncadd (%p714_p8), %s234_s24, 4294967168  ;;  %v640_v0 = vmov 0   ;;  %v282_v1 = vld [vmem:[%s800_s2] sm:$0xf]  ;;  %p273_p4 = scmp.lt.s32.totalorder %s630_s18, 1  ;;  %s460_s12 = sshll.u32 %s630_s18, 3 }
  0x21   : > { %525 = vset.pattern.permute.xlu0 %v640_v0  ;;  %v283_v2 = vld [vmem:[%s801_s3] sm:$0xf]  ;;  %v641_v8 = vmov 839922192   ;;  %vm301_vm0 = vcmask 1043456   ;;  %s332_s24 = scalar_lea.hbm %s802_s4, %s460_s12  ;;  %s270_s25 = scalar_lea.vmem [#allocation5], %s451_s22 }
  0x22   : > { %293 = vperm.xlu0 %525, %v282_v1   ;;  %s274_s8 = scalar_select %p273_p4, %s630_s18, 1  ;;  %v310_v9 = vunpack.c.l.s4 %v641_v8  ;;  %v284_v13 = vld [vmem:[%s237_s26] sm:$0xff] }
  0x23   : > { %s334_s5 = sshll.u32 %s270_s25, 4  ;;  %s336_s6 = sshll.u32 %s332_s24, 4  ;;  %s335_s5 = int_to_ptr.vmem [resolvable:$true] %s334_s5  ;;  %s337_s6 = int_to_ptr.hbm [resolvable:$true] %s336_s6 }
  0x24   : > { %s453_s9 = sshll.u32 %s274_s8, 1  ;;  %v311_v12 = vunpack.c.0.s8 %v310_v9  ;;  %s317_s18 = scalar_lea.sflag [#allocation4], %s741_s21 }
  0x25   : > { %s279_s11 = scalar_lea.vmem %s799_s1, %s453_s9  ;;  %s570_s7 = sshra.s32 %s337_s6, 4  ;;  %s571_s7 = int_to_ptr.hbm [resolvable:$true] %s570_s7 }
  0x26   : > { %v285_v3 = vld [vmem:[%s279_s11] sm:$0x3]  ;;  %s572_s8 = scalar_lea.hbm %s571_s7, 8  ;;  %s576_s22 = scalar_lea.hbm %s802_s4, 16 }
  0x27   : > { %v288_v4 = vperm.slane %v285_v3, 1  ;;  %v287_v5 = vperm.slane %v285_v3, 0  ;;  %p573_p5 = scmp.ne.s32.totalorder %s571_s7, %s572_s8  ;;  %p577_p8 = scmp.lt.s32.totalorder %s571_s7, %s802_s4 }
  0x28   : > { %p578_p10 = scmp.lt.s32.totalorder %s576_s22, %s572_s8 }
  0x29   : > { %p574_p6 = pnand %p573_p5, %p718_p9 }
  0x2a   : > { %307 = vperm.xlu0 %525, %v283_v2   ;;  %p579_p13 = por %p578_p10, %p577_p8 }
  0x2b   : > { %p575_p7 = pneg %p574_p6 }
  0x2d   : > { %p580_p0 = pnand %p579_p13, %p575_p7 }
  0x94   : > { %v294_v6 = vpop.permute.xlu0 %293 }
  0x95   : > { %v297_v7 = vmul.f32 %v294_v6, %v288_v4  ;;  %v296_v11 = vmul.f32 %v294_v6, %v287_v5 }
  0x97   : > { %v300_v10 = vrot.slane %v297_v7, 4 }
  0x99   : > { %v302_v14 = vsel %vm301_vm0, %v296_v11, %v300_v10 }
  0x9a   : > { %v304_v16 = vadd.f32 %v302_v14, %v284_v13 }
  0x9c   : > { %v308_v15 = vpop.permute.xlu0 %307 }
  0x9d   : > { %v312_v17 = vperm.slane %v308_v15, %v311_v12 }
  0x9f   : > { %v314_v18 = vadd.f32 %v312_v17, %v304_v16 }
  0xa1   : > { %315 = vst [vmem:[%s270_s25] sm:$0xff] %v314_v18 }
  0xa2   : > { %583 = shalt.err (!%p580_p0)
}
  0xa3   : > { %463 = dma.vmem_to_hbm [thread:$0]  (%p718_p9), %s335_s5, 128, %s337_s6, %s317_s18  }
  0xa4 PF: > { %s348_s21 = sand.u32 1, %s618_s15   ;;  %p470_p1 = pnand %p446_p12, %p725_p11 }
  0xa5   : > { %s349_s11 = scalar_lea.sflag [#allocation4], %s348_s21 }
  0xa6   : > { %p471_p2 = pneg %p470_p1 }
  0xa8   : > { %613 = dma.done.wait (%p471_p2), %s349_s11, 128  }
  0xa9   : > { %615 = vsyncadd (%p471_p2), %s349_s11, 4294967168  ;;  %s20_s20 = sadd.s32 1, %s638_s20   ;;  %s807_s15 = smov %s622_s16 }
  0xaa   : > { %p17_p3 = scmp.ge.s32.totalorder %s20_s20, 4   ;;  %s808_s16 = smov %s626_s17 }
  0xab   : > { %s809_s17 = smov %s723_s29  ;;  %s810_s18 = smov %s634_s19 }
  0xac   : > { %s811_s19 = smov %s813_s23  ;;  %19 = sbr.rel (!%p17_p3) target bundleno = 6 (0x6), region = 84 }
  0xb1   :  { %355 = vsyncpa [#allocation3], 1 }
  0xb2   :  { %357 = vsyncpa [#allocation3 + $0x1], 1 }
  0xb3   :  { %358 = vsyncpa [#allocation4], 1 }
  0xb4   :  { %360 = vsyncpa [#allocation4 + $0x1], 1 }

</bundles_post_ra>
